<compile_context>
chip_gen: v6e
topology: v6e:2x2x1
jax: 0.10.0
libtpu: 0.0.40
codegen_flags: <defaults>
</compile_context>

<pallas_src>
import math
import jax
import jax.numpy as jnp
from jax import lax
from jax.experimental import pallas as pl
from jax.experimental.pallas import tpu as pltpu  # noqa: F401  (TPU backend)

# ----- model hyper-parameters (small, consistent with the module) -----
B = 2          # batch
S = 8          # sequence length
W = 32         # width (embed_dim)
H = 4          # heads
DH = W // H    # head dim
N = B * S      # flattened rows
FW = 4 * W     # MLP hidden width (128) == slab lane width
EPS = 1e-5     # nn.LayerNorm default eps
NEG = -1e30    # large finite negative for masking (no NaN on fully-masked rows)

# slab row offsets (all rows are 128 lanes wide, f32)
R_WQKV = 0            # (W, 128)  : W_qkv^T, cols 0:96 used
R_WO = W              # (W, 128)  : W_o^T,   cols 0:32 used
R_WFC = 2 * W         # (W, 128)  : W_fc^T,  full width
R_WPROJ = 3 * W       # (4W, 128) : W_proj^T, cols 0:32 used
R_SMALL = 7 * W       # 8 rows of small params
SLAB_ROWS = R_SMALL + 8   # 232


def _layernorm(v, g, b):
    mu = jnp.mean(v, axis=-1, keepdims=True)
    var = jnp.mean(jnp.square(v - mu), axis=-1, keepdims=True)
    return (v - mu) * lax.rsqrt(var + EPS) * g + b


def _gelu_exact(v):
    # PyTorch nn.GELU() default: exact erf formulation.
    return 0.5 * v * (1.0 + lax.erf(v * (1.0 / math.sqrt(2.0))))


def _bdot(a, b, ca, cb):
    """Rank-3 batched matmul: batch dim 0, contract a[ca] with b[cb]."""
    return lax.dot_general(a, b, (((ca,), (cb,)), ((0,), (0,))),
                           preferred_element_type=jnp.float32)


def block_kernel(x_ref, mask_ref, slab_ref, o_ref):
    x = x_ref[...].astype(jnp.float32)          # (N, W)
    amask = mask_ref[...]                       # (N, N) additive mask

    # ---- static views into the packed param slab (loaded once each) ----
    wqkv_t = slab_ref[R_WQKV:R_WQKV + W, :]             # (W, 128), cols 96: zero
    wo_t = slab_ref[R_WO:R_WO + W, 0:W]                  # (W, W)
    wfc_t = slab_ref[R_WFC:R_WFC + W, :]                 # (W, 4W)
    wproj_t = slab_ref[R_WPROJ:R_WPROJ + FW, 0:W]        # (4W, W)
    bqkv = slab_ref[R_SMALL + 0:R_SMALL + 1, :]          # (1, 128), zero-padded
    ln1_g = slab_ref[R_SMALL + 1:R_SMALL + 2, 0:W]
    ln1_b = slab_ref[R_SMALL + 2:R_SMALL + 3, 0:W]
    ln2_g = slab_ref[R_SMALL + 3:R_SMALL + 4, 0:W]
    ln2_b = slab_ref[R_SMALL + 4:R_SMALL + 5, 0:W]
    bo = slab_ref[R_SMALL + 5:R_SMALL + 6, 0:W]
    bproj = slab_ref[R_SMALL + 6:R_SMALL + 7, 0:W]
    bfc = slab_ref[R_SMALL + 7:R_SMALL + 8, :]           # (1, 4W)

    # ---- ln_1 ----
    h1 = _layernorm(x, ln1_g, ln1_b)                      # (N, W)

    # ---- fused QKV projection: one lane-dense matmul + one bias row ----
    qkv = jnp.dot(h1, wqkv_t, preferred_element_type=jnp.float32) + bqkv  # (N,128)

    # split into heads: lane slices + leading-axis stack -> (H, N, DH)
    def split_heads(col0):
        return jnp.stack(
            [qkv[:, col0 + h * DH: col0 + (h + 1) * DH] for h in range(H)],
            axis=0)

    q = split_heads(0)          # (H, N, DH)
    k = split_heads(W)
    v = split_heads(2 * W)

    # ---- scaled dot-product attention (head axis = dot_general batch dim) ----
    s = _bdot(q, k, 2, 2) * (1.0 / math.sqrt(DH)) + amask[None]   # (H, N, N)
    s = s - jnp.max(s, axis=-1, keepdims=True)
    e = jnp.exp(s)
    p = e * pl.reciprocal(jnp.sum(e, axis=-1, keepdims=True), approx=True)
    o = _bdot(p, v, 2, 1)                                          # (H, N, DH)

    # merge heads along lanes (head-major, matches torch concat) -> 1 matmul
    attn_in = jnp.concatenate([o[h] for h in range(H)], axis=-1)   # (N, W)
    attn = jnp.dot(attn_in, wo_t, preferred_element_type=jnp.float32) + bo
    x1 = x + attn

    # ---- ln_2 + MLP (c_proj(gelu(c_fc(.)))) + residual ----
    h2 = _layernorm(x1, ln2_g, ln2_b)
    fc = jnp.dot(h2, wfc_t, preferred_element_type=jnp.float32) + bfc
    fc = _gelu_exact(fc)
    proj = jnp.dot(fc, wproj_t, preferred_element_type=jnp.float32) + bproj

    o_ref[...] = (x1 + proj).astype(o_ref.dtype)


def _prepare_inputs(x, key_padding_mask, p):
    """All weight re-layouts / packing happen here (XLA side, once per call)."""
    xf = x.reshape(N, W).astype(jnp.float32)

    # Additive (N, N) mask: blocks cross-batch attention, applies key padding.
    bid = jnp.arange(N, dtype=jnp.int32) // S
    same = bid[:, None] == bid[None, :]
    if key_padding_mask is None:
        pad = jnp.zeros((N,), jnp.float32)
    else:
        pad = jnp.where(key_padding_mask.reshape(N), NEG, 0.0).astype(jnp.float32)
    amask = jnp.where(same, pad[None, :], NEG).astype(jnp.float32)

    def pad_lanes(a):                            # (r, c<=128) -> (r, 128)
        a = jnp.asarray(a, jnp.float32)
        if a.ndim == 1:
            a = a[None, :]
        return jnp.pad(a, ((0, 0), (0, FW - a.shape[1])))

    slab = jnp.concatenate([
        pad_lanes(p["wqkv"].T),     # rows   0: 32  (W, 3W) -> q|k|v columns
        pad_lanes(p["wo"].T),       # rows  32: 64
        pad_lanes(p["wfc"].T),      # rows  64: 96  (W, 4W)
        pad_lanes(p["wproj"].T),    # rows  96:224  (4W, W)
        pad_lanes(p["bqkv"]),       # row 224
        pad_lanes(p["ln1_g"]),      # row 225
        pad_lanes(p["ln1_b"]),      # row 226
        pad_lanes(p["ln2_g"]),      # row 227
        pad_lanes(p["ln2_b"]),      # row 228
        pad_lanes(p["bo"]),         # row 229
        pad_lanes(p["bproj"]),      # row 230
        pad_lanes(p["bfc"]),        # row 231
    ], axis=0)                      # (232, 128) f32, lane-dense single DMA
    assert slab.shape == (SLAB_ROWS, FW)
    return xf, amask, slab


def residual_attention_block(x, key_padding_mask, params):
    """x: (B, S, W) f32. key_padding_mask: (B, S) bool (True = ignore) or None."""
    inputs = _prepare_inputs(x, key_padding_mask, params)

    flops = (2 * N * W * FW                 # fused qkv (128-lane padded)
             + 2 * 2 * H * N * N * DH       # scores + p @ v
             + 2 * N * W * W                # out-projection
             + 2 * 2 * N * W * FW)          # c_fc + c_proj
    transcendentals = H * N * N + N * FW + H * N + 2 * N
    bytes_accessed = sum(int(a.size) * 4 for a in inputs) + N * W * 4

    out = pl.pallas_call(
        block_kernel,
        out_shape=jax.ShapeDtypeStruct((N, W), x.dtype),
        cost_estimate=pl.CostEstimate(flops=flops,
                                      transcendentals=transcendentals,
                                      bytes_accessed=bytes_accessed),
    )(*inputs)
    return out.reshape(B, S, W)


def init_params(key):
    ks = jax.random.split(key, 8)
    return {
        # nn.MultiheadAttention in_proj / out_proj (torch layout)
        "wqkv": 0.05 * jax.random.normal(ks[0], (3 * W, W), jnp.float32),
        "bqkv": 0.02 * jax.random.normal(ks[1], (3 * W,), jnp.float32),
        "wo":   0.05 * jax.random.normal(ks[2], (W, W), jnp.float32),
        "bo":   0.02 * jax.random.normal(ks[3], (W,), jnp.float32),
        # LayerNorms
        "ln1_g": jnp.ones((W,), jnp.float32),
        "ln1_b": jnp.zeros((W,), jnp.float32),
        "ln2_g": jnp.ones((W,), jnp.float32),
        "ln2_b": jnp.zeros((W,), jnp.float32),
        # MLP: c_fc (4W, W), c_proj (W, 4W)  (torch layout)
        "wfc":   0.05 * jax.random.normal(ks[4], (4 * W, W), jnp.float32),
        "bfc":   0.02 * jax.random.normal(ks[5], (4 * W,), jnp.float32),
        "wproj": 0.05 * jax.random.normal(ks[6], (W, 4 * W), jnp.float32),
        "bproj": 0.02 * jax.random.normal(ks[7], (W,), jnp.float32),
    }


def reference(x, key_padding_mask, p):
    """Pure-JAX reference (same math as the PyTorch module, eval mode)."""
    hp = lax.Precision.HIGHEST

    def ln(v, g, b):
        mu = v.mean(-1, keepdims=True)
        var = ((v - mu) ** 2).mean(-1, keepdims=True)
        return (v - mu) / jnp.sqrt(var + EPS) * g + b

    qkv_in = ln(x, p["ln1_g"], p["ln1_b"])
    qkv = jnp.einsum("bsw,ow->bso", qkv_in, p["wqkv"], precision=hp) + p["bqkv"]
    q, k, v = qkv[..., :W], qkv[..., W:2 * W], qkv[..., 2 * W:]
    q = q.reshape(B, S, H, DH).transpose(0, 2, 1, 3)
    k = k.reshape(B, S, H, DH).transpose(0, 2, 1, 3)
    v = v.reshape(B, S, H, DH).transpose(0, 2, 1, 3)
    scores = jnp.einsum("bhqd,bhkd->bhqk", q, k, precision=hp) / math.sqrt(DH)
    if key_padding_mask is not None:
        scores = scores + jnp.where(key_padding_mask, NEG, 0.0)[:, None, None, :]
    pattn = jax.nn.softmax(scores, axis=-1)
    out = jnp.einsum("bhqk,bhkd->bhqd", pattn, v, precision=hp)
    out = out.transpose(0, 2, 1, 3).reshape(B, S, W)
    out = jnp.einsum("bsw,ow->bso", out, p["wo"], precision=hp) + p["bo"]
    x1 = x + out

    h2 = ln(x1, p["ln2_g"], p["ln2_b"])
    fc = jnp.einsum("bsw,ow->bso", h2, p["wfc"], precision=hp) + p["bfc"]
    fc = 0.5 * fc * (1.0 + lax.erf(fc / math.sqrt(2.0)))
    proj = jnp.einsum("bso,wo->bsw", fc, p["wproj"], precision=hp) + p["bproj"]
    return x1 + proj


if __name__ == "__main__":
    key = jax.random.PRNGKey(0)
    kx, kp = jax.random.split(key)
    x = jax.random.normal(kx, (B, S, W), jnp.float32)
    params = init_params(kp)

    # 1) no key_padding_mask
    out = jax.block_until_ready(residual_attention_block(x, None, params))
    ref = reference(x, None, params)
    assert out.shape == (B, S, W) and out.dtype == jnp.float32
    assert jnp.allclose(out, ref, rtol=1e-2, atol=1e-2), float(
        jnp.max(jnp.abs(out - ref)))

    # 2) boolean key_padding_mask (True = ignore key)
    kpm = jnp.zeros((B, S), jnp.bool_).at[1, S - 2:].set(True)
    out_m = jax.block_until_ready(residual_attention_block(x, kpm, params))
    ref_m = reference(x, kpm, params)
    assert jnp.allclose(out_m, ref_m, rtol=1e-2, atol=1e-2), float(
        jnp.max(jnp.abs(out_m - ref_m)))

    print("KERNEL_OK")
</pallas_src>

<mosaic_0001>
module attributes {stable_mosaic.version = 11 : i64} {
  func.func @block_kernel(%arg0: memref<16x32xf32, #tpu.memory_space<vmem>>, %arg1: memref<16x16xf32, #tpu.memory_space<vmem>>, %arg2: memref<232x128xf32, #tpu.memory_space<vmem>>, %arg3: memref<16x32xf32, #tpu.memory_space<vmem>>) attributes {dimension_semantics = [], scalar_prefetch = 0 : i64, scratch_operands = 0 : i64, tpu.core_type = #tpu.core_type<tc>} {
    %c0 = arith.constant 0 : index
    %c0_0 = arith.constant 0 : index
    %0 = vector.load %arg0[%c0, %c0_0] : memref<16x32xf32, #tpu.memory_space<vmem>>, vector<16x32xf32>
    %c0_1 = arith.constant 0 : index
    %c0_2 = arith.constant 0 : index
    %1 = vector.load %arg1[%c0_1, %c0_2] : memref<16x16xf32, #tpu.memory_space<vmem>>, vector<16x16xf32>
    %c0_3 = arith.constant 0 : index
    %c0_4 = arith.constant 0 : index
    %2 = vector.load %arg2[%c0_3, %c0_4] : memref<232x128xf32, #tpu.memory_space<vmem>>, vector<32x128xf32>
    %c32 = arith.constant 32 : index
    %c0_5 = arith.constant 0 : index
    %3 = vector.load %arg2[%c32, %c0_5] : memref<232x128xf32, #tpu.memory_space<vmem>>, vector<32x32xf32>
    %c64 = arith.constant 64 : index
    %c0_6 = arith.constant 0 : index
    %4 = vector.load %arg2[%c64, %c0_6] : memref<232x128xf32, #tpu.memory_space<vmem>>, vector<32x128xf32>
    %c96 = arith.constant 96 : index
    %c0_7 = arith.constant 0 : index
    %5 = vector.load %arg2[%c96, %c0_7] : memref<232x128xf32, #tpu.memory_space<vmem>>, vector<128x32xf32>
    %c224 = arith.constant 224 : index
    %c0_8 = arith.constant 0 : index
    %6 = vector.load %arg2[%c224, %c0_8] : memref<232x128xf32, #tpu.memory_space<vmem>>, vector<1x128xf32>
    %c225 = arith.constant 225 : index
    %c0_9 = arith.constant 0 : index
    %7 = vector.load %arg2[%c225, %c0_9] : memref<232x128xf32, #tpu.memory_space<vmem>>, vector<1x32xf32>
    %c226 = arith.constant 226 : index
    %c0_10 = arith.constant 0 : index
    %8 = vector.load %arg2[%c226, %c0_10] : memref<232x128xf32, #tpu.memory_space<vmem>>, vector<1x32xf32>
    %c227 = arith.constant 227 : index
    %c0_11 = arith.constant 0 : index
    %9 = vector.load %arg2[%c227, %c0_11] : memref<232x128xf32, #tpu.memory_space<vmem>>, vector<1x32xf32>
    %c228 = arith.constant 228 : index
    %c0_12 = arith.constant 0 : index
    %10 = vector.load %arg2[%c228, %c0_12] : memref<232x128xf32, #tpu.memory_space<vmem>>, vector<1x32xf32>
    %c229 = arith.constant 229 : index
    %c0_13 = arith.constant 0 : index
    %11 = vector.load %arg2[%c229, %c0_13] : memref<232x128xf32, #tpu.memory_space<vmem>>, vector<1x32xf32>
    %c230 = arith.constant 230 : index
    %c0_14 = arith.constant 0 : index
    %12 = vector.load %arg2[%c230, %c0_14] : memref<232x128xf32, #tpu.memory_space<vmem>>, vector<1x32xf32>
    %c231 = arith.constant 231 : index
    %c0_15 = arith.constant 0 : index
    %13 = vector.load %arg2[%c231, %c0_15] : memref<232x128xf32, #tpu.memory_space<vmem>>, vector<1x128xf32>
    %cst = arith.constant dense<0.000000e+00> : vector<16xf32>
    %14 = vector.multi_reduction <add>, %0, %cst [1] : vector<16x32xf32> to vector<16xf32>
    %15 = vector.shape_cast %14 : vector<16xf32> to vector<16x1xf32>
    %cst_16 = arith.constant 3.200000e+01 : f32
    %16 = vector.broadcast %cst_16 : f32 to vector<16x1xf32>
    %17 = arith.divf %15, %16 : vector<16x1xf32>
    %18 = vector.broadcast %17 : vector<16x1xf32> to vector<16x32xf32>
    %19 = arith.subf %0, %18 : vector<16x32xf32>
    %20 = arith.mulf %19, %19 : vector<16x32xf32>
    %cst_17 = arith.constant dense<0.000000e+00> : vector<16xf32>
    %21 = vector.multi_reduction <add>, %20, %cst_17 [1] : vector<16x32xf32> to vector<16xf32>
    %22 = vector.shape_cast %21 : vector<16xf32> to vector<16x1xf32>
    %cst_18 = arith.constant 3.200000e+01 : f32
    %23 = vector.broadcast %cst_18 : f32 to vector<16x1xf32>
    %24 = arith.divf %22, %23 : vector<16x1xf32>
    %25 = vector.broadcast %17 : vector<16x1xf32> to vector<16x32xf32>
    %26 = arith.subf %0, %25 : vector<16x32xf32>
    %cst_19 = arith.constant 9.99999974E-6 : f32
    %27 = vector.broadcast %cst_19 : f32 to vector<16x1xf32>
    %28 = arith.addf %24, %27 : vector<16x1xf32>
    %29 = math.rsqrt %28 : vector<16x1xf32>
    %30 = vector.broadcast %29 : vector<16x1xf32> to vector<16x32xf32>
    %31 = arith.mulf %26, %30 : vector<16x32xf32>
    %32 = vector.broadcast %7 : vector<1x32xf32> to vector<16x32xf32>
    %33 = arith.mulf %31, %32 : vector<16x32xf32>
    %34 = vector.broadcast %8 : vector<1x32xf32> to vector<16x32xf32>
    %35 = arith.addf %33, %34 : vector<16x32xf32>
    %cst_20 = arith.constant dense<0.000000e+00> : vector<16x128xf32>
    %36 = tpu.matmul %35, %2, %cst_20 {dimension_numbers = #tpu.dot_dimension_numbers<[1], [0], [0], [1], [0, 0, 1, 1], [], []>} : vector<16x32xf32>, vector<32x128xf32>, vector<16x128xf32> -> vector<16x128xf32>
    %37 = vector.broadcast %6 : vector<1x128xf32> to vector<16x128xf32>
    %38 = arith.addf %36, %37 : vector<16x128xf32>
    %39 = vector.extract_strided_slice %38 {offsets = [0, 0], sizes = [16, 8], strides = [1, 1]} : vector<16x128xf32> to vector<16x8xf32>
    %40 = vector.extract_strided_slice %38 {offsets = [0, 8], sizes = [16, 8], strides = [1, 1]} : vector<16x128xf32> to vector<16x8xf32>
    %41 = vector.extract_strided_slice %38 {offsets = [0, 16], sizes = [16, 8], strides = [1, 1]} : vector<16x128xf32> to vector<16x8xf32>
    %42 = vector.extract_strided_slice %38 {offsets = [0, 24], sizes = [16, 8], strides = [1, 1]} : vector<16x128xf32> to vector<16x8xf32>
    %43 = vector.shape_cast %39 : vector<16x8xf32> to vector<1x16x8xf32>
    %44 = vector.shape_cast %40 : vector<16x8xf32> to vector<1x16x8xf32>
    %45 = vector.shape_cast %41 : vector<16x8xf32> to vector<1x16x8xf32>
    %46 = vector.shape_cast %42 : vector<16x8xf32> to vector<1x16x8xf32>
    %47 = tpu.concatenate %43, %44, %45, %46 in 0 : vector<1x16x8xf32>, vector<1x16x8xf32>, vector<1x16x8xf32>, vector<1x16x8xf32> -> vector<4x16x8xf32>
    %48 = vector.extract_strided_slice %38 {offsets = [0, 32], sizes = [16, 8], strides = [1, 1]} : vector<16x128xf32> to vector<16x8xf32>
    %49 = vector.extract_strided_slice %38 {offsets = [0, 40], sizes = [16, 8], strides = [1, 1]} : vector<16x128xf32> to vector<16x8xf32>
    %50 = vector.extract_strided_slice %38 {offsets = [0, 48], sizes = [16, 8], strides = [1, 1]} : vector<16x128xf32> to vector<16x8xf32>
    %51 = vector.extract_strided_slice %38 {offsets = [0, 56], sizes = [16, 8], strides = [1, 1]} : vector<16x128xf32> to vector<16x8xf32>
    %52 = vector.shape_cast %48 : vector<16x8xf32> to vector<1x16x8xf32>
    %53 = vector.shape_cast %49 : vector<16x8xf32> to vector<1x16x8xf32>
    %54 = vector.shape_cast %50 : vector<16x8xf32> to vector<1x16x8xf32>
    %55 = vector.shape_cast %51 : vector<16x8xf32> to vector<1x16x8xf32>
    %56 = tpu.concatenate %52, %53, %54, %55 in 0 : vector<1x16x8xf32>, vector<1x16x8xf32>, vector<1x16x8xf32>, vector<1x16x8xf32> -> vector<4x16x8xf32>
    %57 = vector.extract_strided_slice %38 {offsets = [0, 64], sizes = [16, 8], strides = [1, 1]} : vector<16x128xf32> to vector<16x8xf32>
    %58 = vector.extract_strided_slice %38 {offsets = [0, 72], sizes = [16, 8], strides = [1, 1]} : vector<16x128xf32> to vector<16x8xf32>
    %59 = vector.extract_strided_slice %38 {offsets = [0, 80], sizes = [16, 8], strides = [1, 1]} : vector<16x128xf32> to vector<16x8xf32>
    %60 = vector.extract_strided_slice %38 {offsets = [0, 88], sizes = [16, 8], strides = [1, 1]} : vector<16x128xf32> to vector<16x8xf32>
    %61 = vector.shape_cast %57 : vector<16x8xf32> to vector<1x16x8xf32>
    %62 = vector.shape_cast %58 : vector<16x8xf32> to vector<1x16x8xf32>
    %63 = vector.shape_cast %59 : vector<16x8xf32> to vector<1x16x8xf32>
    %64 = vector.shape_cast %60 : vector<16x8xf32> to vector<1x16x8xf32>
    %65 = tpu.concatenate %61, %62, %63, %64 in 0 : vector<1x16x8xf32>, vector<1x16x8xf32>, vector<1x16x8xf32>, vector<1x16x8xf32> -> vector<4x16x8xf32>
    %cst_21 = arith.constant dense<0.000000e+00> : vector<4x16x16xf32>
    %66 = tpu.matmul %47, %56, %cst_21 {dimension_numbers = #tpu.dot_dimension_numbers<[2], [2], [1], [1], [0, 0, 0, 1, 1, 1], [0], [0]>} : vector<4x16x8xf32>, vector<4x16x8xf32>, vector<4x16x16xf32> -> vector<4x16x16xf32>
    %cst_22 = arith.constant 0.353553385 : f32
    %67 = vector.broadcast %cst_22 : f32 to vector<4x16x16xf32>
    %68 = arith.mulf %66, %67 : vector<4x16x16xf32>
    %69 = vector.shape_cast %1 : vector<16x16xf32> to vector<1x16x16xf32>
    %70 = vector.broadcast %69 : vector<1x16x16xf32> to vector<4x16x16xf32>
    %71 = arith.addf %68, %70 : vector<4x16x16xf32>
    %cst_23 = arith.constant dense<0xFF800000> : vector<4x16xf32>
    %72 = vector.multi_reduction <maximumf>, %71, %cst_23 [2] : vector<4x16x16xf32> to vector<4x16xf32>
    %73 = vector.shape_cast %72 : vector<4x16xf32> to vector<4x16x1xf32>
    %74 = vector.broadcast %73 : vector<4x16x1xf32> to vector<4x16x16xf32>
    %75 = arith.subf %71, %74 : vector<4x16x16xf32>
    %76 = math.exp %75 : vector<4x16x16xf32>
    %cst_24 = arith.constant dense<0.000000e+00> : vector<4x16xf32>
    %77 = vector.multi_reduction <add>, %76, %cst_24 [2] : vector<4x16x16xf32> to vector<4x16xf32>
    %78 = vector.shape_cast %77 : vector<4x16xf32> to vector<4x16x1xf32>
    %79 = tpu.reciprocal %78 {approx = true} : vector<4x16x1xf32> -> vector<4x16x1xf32>
    %80 = vector.broadcast %79 : vector<4x16x1xf32> to vector<4x16x16xf32>
    %81 = arith.mulf %76, %80 : vector<4x16x16xf32>
    %cst_25 = arith.constant dense<0.000000e+00> : vector<4x16x8xf32>
    %82 = tpu.matmul %81, %65, %cst_25 {dimension_numbers = #tpu.dot_dimension_numbers<[2], [1], [1], [2], [0, 0, 0, 1, 1, 2], [0], [0]>} : vector<4x16x16xf32>, vector<4x16x8xf32>, vector<4x16x8xf32> -> vector<4x16x8xf32>
    %83 = vector.extract_strided_slice %82 {offsets = [0, 0, 0], sizes = [1, 16, 8], strides = [1, 1, 1]} : vector<4x16x8xf32> to vector<1x16x8xf32>
    %84 = vector.shape_cast %83 : vector<1x16x8xf32> to vector<16x8xf32>
    %85 = vector.extract_strided_slice %82 {offsets = [1, 0, 0], sizes = [1, 16, 8], strides = [1, 1, 1]} : vector<4x16x8xf32> to vector<1x16x8xf32>
    %86 = vector.shape_cast %85 : vector<1x16x8xf32> to vector<16x8xf32>
    %87 = vector.extract_strided_slice %82 {offsets = [2, 0, 0], sizes = [1, 16, 8], strides = [1, 1, 1]} : vector<4x16x8xf32> to vector<1x16x8xf32>
    %88 = vector.shape_cast %87 : vector<1x16x8xf32> to vector<16x8xf32>
    %89 = vector.extract_strided_slice %82 {offsets = [3, 0, 0], sizes = [1, 16, 8], strides = [1, 1, 1]} : vector<4x16x8xf32> to vector<1x16x8xf32>
    %90 = vector.shape_cast %89 : vector<1x16x8xf32> to vector<16x8xf32>
    %91 = tpu.concatenate %84, %86, %88, %90 in 1 : vector<16x8xf32>, vector<16x8xf32>, vector<16x8xf32>, vector<16x8xf32> -> vector<16x32xf32>
    %cst_26 = arith.constant dense<0.000000e+00> : vector<16x32xf32>
    %92 = tpu.matmul %91, %3, %cst_26 {dimension_numbers = #tpu.dot_dimension_numbers<[1], [0], [0], [1], [0, 0, 1, 1], [], []>} : vector<16x32xf32>, vector<32x32xf32>, vector<16x32xf32> -> vector<16x32xf32>
    %93 = vector.broadcast %11 : vector<1x32xf32> to vector<16x32xf32>
    %94 = arith.addf %92, %93 : vector<16x32xf32>
    %95 = arith.addf %0, %94 : vector<16x32xf32>
    %cst_27 = arith.constant dense<0.000000e+00> : vector<16xf32>
    %96 = vector.multi_reduction <add>, %95, %cst_27 [1] : vector<16x32xf32> to vector<16xf32>
    %97 = vector.shape_cast %96 : vector<16xf32> to vector<16x1xf32>
    %cst_28 = arith.constant 3.200000e+01 : f32
    %98 = vector.broadcast %cst_28 : f32 to vector<16x1xf32>
    %99 = arith.divf %97, %98 : vector<16x1xf32>
    %100 = vector.broadcast %99 : vector<16x1xf32> to vector<16x32xf32>
    %101 = arith.subf %95, %100 : vector<16x32xf32>
    %102 = arith.mulf %101, %101 : vector<16x32xf32>
    %cst_29 = arith.constant dense<0.000000e+00> : vector<16xf32>
    %103 = vector.multi_reduction <add>, %102, %cst_29 [1] : vector<16x32xf32> to vector<16xf32>
    %104 = vector.shape_cast %103 : vector<16xf32> to vector<16x1xf32>
    %cst_30 = arith.constant 3.200000e+01 : f32
    %105 = vector.broadcast %cst_30 : f32 to vector<16x1xf32>
    %106 = arith.divf %104, %105 : vector<16x1xf32>
    %107 = vector.broadcast %99 : vector<16x1xf32> to vector<16x32xf32>
    %108 = arith.subf %95, %107 : vector<16x32xf32>
    %cst_31 = arith.constant 9.99999974E-6 : f32
    %109 = vector.broadcast %cst_31 : f32 to vector<16x1xf32>
    %110 = arith.addf %106, %109 : vector<16x1xf32>
    %111 = math.rsqrt %110 : vector<16x1xf32>
    %112 = vector.broadcast %111 : vector<16x1xf32> to vector<16x32xf32>
    %113 = arith.mulf %108, %112 : vector<16x32xf32>
    %114 = vector.broadcast %9 : vector<1x32xf32> to vector<16x32xf32>
    %115 = arith.mulf %113, %114 : vector<16x32xf32>
    %116 = vector.broadcast %10 : vector<1x32xf32> to vector<16x32xf32>
    %117 = arith.addf %115, %116 : vector<16x32xf32>
    %cst_32 = arith.constant dense<0.000000e+00> : vector<16x128xf32>
    %118 = tpu.matmul %117, %4, %cst_32 {dimension_numbers = #tpu.dot_dimension_numbers<[1], [0], [0], [1], [0, 0, 1, 1], [], []>} : vector<16x32xf32>, vector<32x128xf32>, vector<16x128xf32> -> vector<16x128xf32>
    %119 = vector.broadcast %13 : vector<1x128xf32> to vector<16x128xf32>
    %120 = arith.addf %118, %119 : vector<16x128xf32>
    %cst_33 = arith.constant 5.000000e-01 : f32
    %121 = vector.broadcast %cst_33 : f32 to vector<16x128xf32>
    %122 = arith.mulf %121, %120 : vector<16x128xf32>
    %cst_34 = arith.constant 0.707106769 : f32
    %123 = vector.broadcast %cst_34 : f32 to vector<16x128xf32>
    %124 = arith.mulf %120, %123 : vector<16x128xf32>
    %125 = math.erf %124 : vector<16x128xf32>
    %cst_35 = arith.constant 1.000000e+00 : f32
    %126 = vector.broadcast %cst_35 : f32 to vector<16x128xf32>
    %127 = arith.addf %126, %125 : vector<16x128xf32>
    %128 = arith.mulf %122, %127 : vector<16x128xf32>
    %cst_36 = arith.constant dense<0.000000e+00> : vector<16x32xf32>
    %129 = tpu.matmul %128, %5, %cst_36 {dimension_numbers = #tpu.dot_dimension_numbers<[1], [0], [0], [1], [0, 0, 1, 1], [], []>} : vector<16x128xf32>, vector<128x32xf32>, vector<16x32xf32> -> vector<16x32xf32>
    %130 = vector.broadcast %12 : vector<1x32xf32> to vector<16x32xf32>
    %131 = arith.addf %129, %130 : vector<16x32xf32>
    %132 = arith.addf %95, %131 : vector<16x32xf32>
    %c0_37 = arith.constant 0 : index
    %c0_38 = arith.constant 0 : index
    %133 = vector.load %arg3[%c0_37, %c0_38] : memref<16x32xf32, #tpu.memory_space<vmem>>, vector<16x32xf32>
    tpu.vector_store %arg3[%c0_37, %c0_38], %132 {strides = array<i32>} : memref<16x32xf32, #tpu.memory_space<vmem>>, vector<16x32xf32>,
    return
  }
}

</mosaic_0001>

<bundles_post_ra>
// kernel: tpu_custom_call.1
= control target key start
LH: loop header
LB: loop body
LE: loop exit
PB: predicated region body
PF: predicated region fallthrough
CT: control target
= control target key end

     0   :  { %8 = vsyncpa [#allocation3], 0  ;;  %s1979_s0 = inlined_call_operand.hbm [shape: f32[16,32], index: 0, kind: input, shape index: {}]   ;;  %s1980_s1 = inlined_call_operand.hbm [shape: f32[16,16], index: 1, kind: input, shape index: {}]   ;;  %s1981_s2 = inlined_call_operand.hbm [shape: f32[232,128], index: 2, kind: input, shape index: {}]   ;;  %s1982_s3 = inlined_call_operand.hbm [shape: f32[16,32], index: 3, kind: output, shape index: {}]  }
   0x1   :  { %9 = vsyncpa [#allocation6], 0 }
   0x2   :  { %10 = vsyncpa [#allocation4], 0  ;;  %s1762_s12 = smov [#allocation5]   ;;  %s1763_s14 = smov [#allocation2]  }
   0x3   :  { %s28_s13 = sshll.u32 %s1762_s12, 4  ;;  %s16_s15 = sshll.u32 %s1763_s14, 4  ;;  %s29_s13 = int_to_ptr.vmem [resolvable:$true] %s28_s13  ;;  %s17_s15 = int_to_ptr.vmem [resolvable:$true] %s16_s15 }
   0x4   :  { %s1684_s16 = scalar_lea.vmem %s29_s13, 256  ;;  %p1689_p1 = scmp.lt.s32.totalorder %s29_s13, %s29_s13 }
   0x5   :  { %p1685_p0 = scmp.ne.s32.totalorder %s29_s13, %s1684_s16  ;;  %p1690_p2 = scmp.lt.s32.totalorder %s1684_s16, %s1684_s16 }
   0x7   :  { %p1691_p3 = por %p1690_p2, %p1689_p1 }
   0x9   :  { %p1692_p4 = pnand %p1691_p3, %p1685_p0 }
   0xb   :  { %1695 = shalt.err (!%p1692_p4)
}
   0xc   :  { %s1764_s17 = smov 128   ;;  %s1765_s18 = smov 8  }
   0xd   :  { %34 = dma.hbm_to_vmem [thread:$0]  %s1980_s1, 256, %s29_s13, [#allocation6], %s1764_s17, %s1764_s17, %s1765_s18  }
   0xe   :  { %s1704_s21 = scalar_lea.vmem %s17_s15, 256  ;;  %p1709_p6 = scmp.lt.s32.totalorder %s17_s15, %s17_s15 }
   0xf   :  { %p1705_p5 = scmp.ne.s32.totalorder %s17_s15, %s1704_s21  ;;  %p1710_p7 = scmp.lt.s32.totalorder %s1704_s21, %s1704_s21 }
  0x11   :  { %p1711_p8 = por %p1710_p7, %p1709_p6 }
  0x13   :  { %p1712_p9 = pnand %p1711_p8, %p1705_p5 }
  0x15   :  { %1715 = shalt.err (!%p1712_p9)
}
  0x16   :  { %22 = dma.hbm_to_vmem [thread:$0]  %s1979_s0, 256, %s17_s15, [#allocation3], %s1764_s17, %s1764_s17, %s1765_s18  }
  0x17   :  { %s1766_s24 = smov [#allocation7]  }
  0x18   :  { %s40_s25 = sshll.u32 %s1766_s24, 4  ;;  %s41_s25 = int_to_ptr.vmem [resolvable:$true] %s40_s25 }
  0x19   :  { %s1724_s26 = scalar_lea.vmem %s41_s25, 3712  ;;  %p1729_p11 = scmp.lt.s32.totalorder %s41_s25, %s41_s25 }
  0x1a   :  { %p1725_p10 = scmp.ne.s32.totalorder %s41_s25, %s1724_s26  ;;  %p1730_p12 = scmp.lt.s32.totalorder %s1724_s26, %s1724_s26 }
  0x1c   :  { %p1731_p13 = por %p1730_p12, %p1729_p11 }
  0x1e   :  { %p1732_p0 = pnand %p1731_p13, %p1725_p10 }
  0x20   :  { %1735 = shalt.err (!%p1732_p0)
}
  0x21   :  { %46 = dma.hbm_to_vmem [thread:$0]  %s1981_s2, 3712, %s41_s25, [#allocation6], %s1764_s17, %s1764_s17, %s1765_s18  }
  0x22   :  { %1756 = dma.done.wait [#allocation3], 256  }
  0x23   :  { %1757 = vsyncadd [#allocation3], 4294967040 }
  0x24   :  { %1758 = dma.done.wait [#allocation6], 3968  }
  0x25   :  { %1759 = vsyncadd [#allocation6], 4294963328  ;;  %vm96_vm0 = vcmask 261120   ;;  %v1813_v0 = vld [vmem:[#allocation2] sm:$0xff]  ;;  %v1815_v1 = vld [vmem:[#allocation2 + $0x8] sm:$0xff]  ;;  %vm239_vm1 = vcmask 64512  }
  0x26   :  { %v97_v2 = vsel %vm96_vm0, %v1813_v0, 0.0  ;;  %v100_v3 = vsel %vm96_vm0, %v1815_v1, 0.0  ;;  %v63_v14 = vld [vmem:[#allocation7 + $0x18] sm:$0xff]  ;;  %v62_v15 = vld [vmem:[#allocation7 + $0x10] sm:$0xff]  ;;  %v61_v16 = vld [vmem:[#allocation7 + $0x8] sm:$0xff]  ;;  %s1767_s0 = smov 120  }
  0x27   :  { %98 = vadd.xlane.f32.xlu0 %v97_v2  ;;  %1495 = vmatprep.subr.mxu1 %v63_v14  ;;  %v60_v17 = vld [vmem:[#allocation7] sm:$0xff]  ;;  %s1768_s2 = smov 112   ;;  %s1769_s28 = smov 96   ;;  %v59_v54 = vld [vmem:[#allocation5 + $0x8] sm:$0xff]  ;;  %vm600_vm2 = vcmask 130048   ;;  %v58_v57 = vld [vmem:[#allocation5] sm:$0xff] }
  0x28   :  { %1496 = vmatpush3.msra.mxu1 %v63_v14  ;;  %v1389_v25 = vld [vmem:[#allocation7 + $0xe1] ss:$0 sm:$0xff]  ;;  %v1390_v27 = vld [vmem:[#allocation7 + $0xe2] ss:$0 sm:$0xff]  ;;  %v1391_v34 = vld [vmem:[#allocation7 + $0xe0] ss:$0 sm:$0xff] }
  0x29   :  { %1497 = vmatprep.subr.mxu1 %v62_v15  ;;  %s1770_s29 = smov 104   ;;  %s1771_s30 = smov 64   ;;  %vm1065_vm3 = vcmask 195584  }
  0x2a   :  { %1498 = vmatpush3.msra.mxu1 %v62_v15  ;;  %s1772_s4 = smov 16   ;;  %s1773_s5 = smov 24  }
  0x2b   :  { %101 = vadd.xlane.f32.xlu0 %v100_v3  ;;  %1499 = vmatprep.subr.mxu1 %v61_v16  ;;  %s1774_s6 = smov [#allocation8]  }
  0x2c   :  { %1500 = vmatpush3.msra.mxu1 %v61_v16  ;;  %s1376_s7 = sshll.u32 %s1774_s6, 4  ;;  %s1377_s7 = int_to_ptr.vmem [resolvable:$true] %s1376_s7 }
  0x2d   :  { %1501 = vmatprep.subr.mxu1 %v60_v17  ;;  %s1736_s8 = scalar_lea.vmem %s1377_s7, 256  ;;  %p1741_p2 = scmp.lt.s32.totalorder %s1377_s7, %s1377_s7 }
  0x2e   :  { %1502 = vmatpush3.msra.mxu1 %v60_v17  ;;  %p1737_p1 = scmp.ne.s32.totalorder %s1377_s7, %s1736_s8  ;;  %p1742_p3 = scmp.lt.s32.totalorder %s1736_s8, %s1736_s8 }
  0x30   :  { %p1743_p4 = por %p1742_p3, %p1741_p2 }
  0x32   :  { %p1744_p5 = pnand %p1743_p4, %p1737_p1 }
  0xb0   :  { %v99_v4 = vpop.xlane.xlu0 %98 }
  0xb1   :  { %v104_v5 = vmul.f32 0.03125, %v99_v4 }
  0xb3   :  { %v106_v6 = vsub.f32 %v1813_v0, %v104_v5 }
  0xb4   :  { %v102_v7 = vpop.xlane.xlu0 %101 }
  0xb5   :  { %v105_v8 = vmul.f32 0.03125, %v102_v7  ;;  %v108_v9 = vmul.f32 %v106_v6, %v106_v6 }
  0xb7   :  { %v107_v10 = vsub.f32 %v1815_v1, %v105_v8  ;;  %v110_v11 = vsel %vm96_vm0, %v108_v9, 0.0 }
  0xb8   :  { %111 = vadd.xlane.f32.xlu1 %v110_v11 }
  0xb9   :  { %v109_v12 = vmul.f32 %v107_v10, %v107_v10 }
  0xbb   :  { %v113_v13 = vsel %vm96_vm0, %v109_v12, 0.0 }
  0xbc   :  { %114 = vadd.xlane.f32.xlu1 %v113_v13 }
 0x141   :  { %v112_v18 = vpop.xlane.xlu1 %111 }
 0x142   :  { %v116_v19 = vmul.f32 0.03125, %v112_v18 }
 0x144   :  { %v118_v20 = vadd.f32 1e-05, %v116_v19 }
 0x145   :  { %v115_v21 = vpop.xlane.xlu1 %114 }
 0x146   :  { %1632 = vrsqrt.f32 %v118_v20  ;;  %v117_v22 = vmul.f32 0.03125, %v115_v21 }
 0x148   :  { %v119_v23 = vadd.f32 1e-05, %v117_v22 }
 0x14a   :  { %1634 = vrsqrt.f32 %v119_v23 }
 0x153   :  { %v1633_v24 = vpop.eup %1632 }
 0x154   :  { %v122_v26 = vmul.f32 %v1633_v24, %v106_v6 }
 0x156   :  { %v128_v28 = vmul.f32 %v1389_v25, %v122_v26 }
 0x157   :  { %v1635_v29 = vpop.eup %1634 }
 0x158   :  { %v123_v30 = vmul.f32 %v1635_v29, %v107_v10  ;;  %v134_v31 = vadd.f32 %v1390_v27, %v128_v28 }
 0x15a   :  { %v129_v32 = vmul.f32 %v1389_v25, %v123_v30  ;;  %1503 = vmatprep.mubr.msk.f32.mxu1 %vm96_vm0, %v134_v31 }
 0x15c   :  { %v135_v33 = vadd.f32 %v1390_v27, %v129_v32 }
 0x15e   :  { %1504 = vmatmul.mubr.msk.f32.vlgmr.msra.gmra.mxu1 %vm96_vm0, %v135_v33 }
 0x21e   :  { %v1505_v35 = vpop.f32.mrf.mxu1 }
 0x21f   :  { %v1827_v36 = vadd.f32 %v1505_v35, %v1391_v34 }
 0x220   :  { %v212_v37 = vpop.f32.mrf.mxu1 }
 0x221   :  { %v1829_v38 = vadd.f32 %v1391_v34, %v212_v37  ;;  %225 = vrot.lane.b32.xlu0 %v1827_v36, %s1767_s0 }
 0x223   :  { %223 = vrot.lane.b32.xlu1 %v1829_v38, %s1767_s0  ;;  %1510 = vmatprep.mubr.msk.f32.mxu1 %vm239_vm1, %v1829_v38 }
 0x225   :  { %227 = vrot.lane.b32.xlu0 %v1829_v38, %s1768_s2 }
 0x227   :  { %229 = vrot.lane.b32.xlu1 %v1827_v36, %s1768_s2 }
 0x229   :  { %237 = vrot.lane.b32.xlu0 %v1827_v36, %s1769_s28 }
 0x22b   :  { %233 = vrot.lane.b32.xlu1 %v1827_v36, %s1770_s29 }
 0x22f   :  { %231 = vrot.lane.b32.xlu1 %v1829_v38, %s1770_s29 }
 0x233   :  { %235 = vrot.lane.b32.xlu1 %v1829_v38, %s1769_s28 }
 0x293   :  { %v1841_v39 = vpop.permute.xlu0 %225 }
 0x294   :  { %325 = vrot.lane.b32.xlu0 %v1841_v39, %s1769_s28 }
 0x295   :  { %v1844_v40 = vpop.permute.xlu1 %223 }
 0x296   :  { %323 = vrot.lane.b32.xlu1 %v1844_v40, %s1769_s28 }
 0x297   :  { %v1847_v41 = vpop.permute.xlu0 %227 }
 0x299   :  { %v1849_v42 = vpop.permute.xlu1 %229 }
 0x29a   :  { %412 = vrot.lane.b32.xlu0 %v1849_v42, %s1769_s28 }
 0x29b   :  { %v238_v43 = vpop.permute.xlu0 %237 }
 0x29c   :  { %1506 = vmatprep.subr.msk.mxu1 %vm239_vm1, %v238_v43 }
 0x29d   :  { %1507 = vmatpush3.xpose.msk.msra.mxu1 %vm239_vm1, %v238_v43  ;;  %v1854_v44 = vpop.permute.xlu1 %233 }
 0x29e   :  { %410 = vrot.lane.b32.xlu0 %v1847_v41, %s1769_s28  ;;  %499 = vrot.lane.b32.xlu1 %v1854_v44, %s1769_s28 }
 0x2a1   :  { %v1858_v45 = vpop.permute.xlu1 %231 }
 0x2a2   :  { %1531 = vmatprep.mubr.msk.f32.mxu0 %vm239_vm1, %v1858_v45  ;;  %497 = vrot.lane.b32.xlu1 %v1858_v45, %s1769_s28 }
 0x2a5   :  { %v236_v46 = vpop.permute.xlu1 %235 }
 0x2a6   :  { %1508 = vmatprep.subr.msk.mxu1 %vm239_vm1, %v236_v46 }
 0x2a7   :  { %1509 = vmatpush3.xpose.msk.msra.mxu1 %vm239_vm1, %v236_v46 }
 0x2aa   :  { %1511 = vmatmul.mubr.msk.f32.vlgmr.msra.gmra.mxu1 %vm239_vm1, %v1827_v36 }
 0x2ab   :  { %1517 = vmatprep.mubr.msk.f32.mxu1 %vm239_vm1, %v1844_v40 }
 0x306   :  { %v326_v47 = vpop.permute.xlu0 %325 }
 0x307   :  { %1513 = vmatprep.subr.msk.mxu1 %vm239_vm1, %v326_v47 }
 0x308   :  { %v324_v48 = vpop.permute.xlu1 %323  ;;  %1514 = vmatpush3.xpose.msk.msra.mxu1 %vm239_vm1, %v326_v47 }
 0x309   :  { %1515 = vmatprep.subr.msk.mxu1 %vm239_vm1, %v324_v48 }
 0x30c   :  { %v413_v49 = vpop.permute.xlu0 %412  ;;  %1516 = vmatpush3.xpose.msk.msra.mxu1 %vm239_vm1, %v324_v48 }
 0x30d   :  { %1520 = vmatprep.subr.msk.mxu1 %vm239_vm1, %v413_v49 }
 0x30f   :  { %1518 = vmatmul.mubr.msk.f32.vlgmr.msra.gmra.mxu1 %vm239_vm1, %v1841_v39 }
 0x310   :  { %v411_v50 = vpop.permute.xlu0 %410  ;;  %v500_v51 = vpop.permute.xlu1 %499  ;;  %1521 = vmatpush3.xpose.msk.msra.mxu1 %vm239_vm1, %v413_v49  ;;  %1524 = vmatprep.mubr.msk.f32.mxu1 %vm239_vm1, %v1847_v41 }
 0x311   :  { %1522 = vmatprep.subr.msk.mxu1 %vm239_vm1, %v411_v50  ;;  %1527 = vmatprep.subr.msk.mxu0 %vm239_vm1, %v500_v51 }
 0x312   :  { %1528 = vmatpush3.xpose.msk.msra.mxu0 %vm239_vm1, %v500_v51 }
 0x314   :  { %v498_v52 = vpop.permute.xlu1 %497  ;;  %1523 = vmatpush3.xpose.msk.msra.mxu1 %vm239_vm1, %v411_v50 }
 0x315   :  { %1529 = vmatprep.subr.msk.mxu0 %vm239_vm1, %v498_v52 }
 0x316   :  { %1530 = vmatpush3.xpose.msk.msra.mxu0 %vm239_vm1, %v498_v52 }
 0x317   :  { %1525 = vmatmul.mubr.msk.f32.vlgmr.msra.gmra.mxu1 %vm239_vm1, %v1849_v42 }
 0x319   :  { %1532 = vmatmul.mubr.msk.f32.vlgmr.msra.gmra.mxu0 %vm239_vm1, %v1854_v44 }
 0x36a   :  { %v1512_v53 = vpop.f32.mrf.mxu1 }
 0x36b   :  { %v585_v55 = vmul.f32 0.35355338, %v1512_v53 }
 0x36c   :  { %v314_v56 = vpop.f32.mrf.mxu1 }
 0x36d   :  { %v584_v58 = vmul.f32 0.35355338, %v314_v56  ;;  %v593_v59 = vadd.f32 %v585_v55, %v59_v54 }
 0x36f   :  { %v604_v60 = vsel %vm600_vm2, %v593_v59, -inf  ;;  %v592_v61 = vadd.f32 %v584_v58, %v58_v57 }
 0x370   :  { %605 = vmax.xlane.f32.xlu1 %v604_v60 }
 0x371   :  { %v601_v62 = vsel %vm600_vm2, %v592_v61, -inf }
 0x372   :  { %602 = vmax.xlane.f32.xlu0 %v601_v62 }
 0x3cf   :  { %v1519_v63 = vpop.f32.mrf.mxu1 }
 0x3d0   :  { %v587_v2 = vmul.f32 0.35355338, %v1519_v63 }
 0x3d1   :  { %v401_v3 = vpop.f32.mrf.mxu1 }
 0x3d2   :  { %v586_v4 = vmul.f32 0.35355338, %v401_v3  ;;  %v595_v5 = vadd.f32 %v587_v2, %v59_v54 }
 0x3d4   :  { %v610_v6 = vsel %vm600_vm2, %v595_v5, -inf  ;;  %v594_v7 = vadd.f32 %v586_v4, %v58_v57 }
 0x3d5   :  { %611 = vmax.xlane.f32.xlu0 %v610_v6 }
 0x3d6   :  { %v607_v10 = vsel %vm600_vm2, %v594_v7, -inf }
 0x3d7   :  { %v1526_v8 = vpop.f32.mrf.mxu1 }
 0x3d8   :  { %v589_v9 = vmul.f32 0.35355338, %v1526_v8 }
 0x3d9   :  { %v1533_v11 = vpop.f32.mrf.mxu0  ;;  %608 = vmax.xlane.f32.xlu0 %v607_v10  ;;  %v488_v12 = vpop.f32.mrf.mxu1 }
 0x3da   :  { %v591_v13 = vmul.f32 0.35355338, %v1533_v11  ;;  %v588_v14 = vmul.f32 0.35355338, %v488_v12  ;;  %v597_v15 = vadd.f32 %v589_v9, %v59_v54 }
 0x3db   :  { %v575_v16 = vpop.f32.mrf.mxu0 }
 0x3dc   :  { %v590_v17 = vmul.f32 0.35355338, %v575_v16  ;;  %v616_v18 = vsel %vm600_vm2, %v597_v15, -inf  ;;  %v596_v19 = vadd.f32 %v588_v14, %v58_v57  ;;  %v599_v20 = vadd.f32 %v591_v13, %v59_v54 }
 0x3dd   :  { %617 = vmax.xlane.f32.xlu1 %v616_v18 }
 0x3de   :  { %v613_v21 = vsel %vm600_vm2, %v596_v19, -inf  ;;  %v598_v22 = vadd.f32 %v590_v17, %v58_v57  ;;  %v622_v23 = vsel %vm600_vm2, %v599_v20, -inf }
 0x3df   :  { %614 = vmax.xlane.f32.xlu0 %v613_v21 }
 0x3e0   :  { %v619_v24 = vsel %vm600_vm2, %v598_v22, -inf }
 0x3e1   :  { %623 = vmax.xlane.f32.xlu1 %v622_v23 }
 0x3e3   :  { %620 = vmax.xlane.f32.xlu0 %v619_v24 }
 0x3f2   :  { %689 = vrot.lane.b32.xlu1 %v1829_v38, %s1771_s30 }
 0x3f6   :  { %778 = vrot.lane.b32.xlu1 %v1841_v39, %s1771_s30 }
 0x3f9   :  { %691 = vrot.lane.b32.xlu0 %v1827_v36, %s1771_s30  ;;  %v606_v27 = vpop.xlane.xlu1 %605 }
 0x3fa   :  { %776 = vrot.lane.b32.xlu1 %v1844_v40, %s1771_s30  ;;  %v626_v29 = vsub.f32 %v593_v59, %v606_v27 }
 0x3fb   :  { %v603_v25 = vpop.xlane.xlu0 %602 }
 0x3fc   :  { %v625_v26 = vsub.f32 %v592_v61, %v603_v25  ;;  %v635_v30 = vmul.f32 1.442695, %v626_v29 }
 0x3fd   :  { %865 = vrot.lane.b32.xlu0 %v1849_v42, %s1771_s30 }
 0x3fe   :  { %952 = vrot.lane.b32.xlu1 %v1854_v44, %s1771_s30  ;;  %v633_v28 = vmul.f32 1.442695, %v625_v26 }
 0x400   :  { %1636 = vpow2.f32 %v633_v28 }
 0x401   :  { %1638 = vpow2.f32 %v635_v30 }
 0x40d   :  { %v1909_v31 = vpop.eup %1636 }
 0x40e   :  { %v649_v32 = vsel %vm600_vm2, %v1909_v31, 0.0  ;;  %v1913_v33 = vpop.eup %1638 }
 0x40f   :  { %v652_v34 = vsel %vm600_vm2, %v1913_v33, 0.0 }
 0x41c   :  { %650 = vadd.xlane.f32.xlu0 %v649_v32 }
 0x422   :  { %653 = vadd.xlane.f32.xlu1 %v652_v34 }
 0x45e   :  { %v612_v35 = vpop.xlane.xlu0 %611 }
 0x45f   :  { %v628_v36 = vsub.f32 %v595_v5, %v612_v35 }
 0x461   :  { %v639_v37 = vmul.f32 1.442695, %v628_v36 }
 0x462   :  { %v609_v38 = vpop.xlane.xlu0 %608 }
 0x463   :  { %1640 = vpow2.f32 %v639_v37  ;;  %v627_v39 = vsub.f32 %v594_v7, %v609_v38 }
 0x465   :  { %v637_v40 = vmul.f32 1.442695, %v627_v39  ;;  %v67_v39 = vld [vmem:[#allocation7 + $0x38] sm:$0xff] }
 0x466   :  { %v618_v42 = vpop.xlane.xlu1 %617 }
 0x467   :  { %1642 = vpow2.f32 %v637_v40  ;;  %v630_v43 = vsub.f32 %v597_v15, %v618_v42  ;;  %v66_v40 = vld [vmem:[#allocation7 + $0x30] sm:$0xff]  ;;  %v65_v42 = vld [vmem:[#allocation7 + $0x28] sm:$0xff] }
 0x468   :  { %v615_v44 = vpop.xlane.xlu0 %614 }
 0x469   :  { %v629_v47 = vsub.f32 %v596_v19, %v615_v44  ;;  %v643_v49 = vmul.f32 1.442695, %v630_v43  ;;  %v64_v43 = vld [vmem:[#allocation7 + $0x20] sm:$0xff] }
 0x46a   :  { %v624_v46 = vpop.xlane.xlu1 %623 }
 0x46b   :  { %v632_v48 = vsub.f32 %v599_v20, %v624_v46  ;;  %v641_v54 = vmul.f32 1.442695, %v629_v47 }
 0x46c   :  { %v621_v50 = vpop.xlane.xlu0 %620 }
 0x46d   :  { %v647_v51 = vmul.f32 1.442695, %v632_v48  ;;  %v631_v52 = vsub.f32 %v598_v22, %v621_v50 }
 0x46e   :  { %v690_v53 = vpop.permute.xlu1 %689 }
 0x46f   :  { %1644 = vpow2.f32 %v647_v51  ;;  %v645_v55 = vmul.f32 1.442695, %v631_v52 }
 0x470   :  { %v1917_v56 = vpop.eup %1640  ;;  %1646 = vpow2.f32 %v643_v49  ;;  %v692_v57 = vpop.permute.xlu0 %691 }
 0x471   :  { %1648 = vpow2.f32 %v645_v55  ;;  %1534 = vmatprep.subr.mxu1 %v692_v57  ;;  %v658_v58 = vsel %vm600_vm2, %v1917_v56, 0.0 }
 0x472   :  { %659 = vadd.xlane.f32.xlu1 %v658_v58  ;;  %1535 = vmatpush3.msra.mxu1 %v692_v57  ;;  %1650 = vpow2.f32 %v641_v54  ;;  %v779_v60 = vpop.permute.xlu1 %778 }
 0x473   :  { %1536 = vmatprep.subr.mxu1 %v690_v53 }
 0x474   :  { %v1643_v59 = vpop.eup %1642  ;;  %1537 = vmatpush3.msra.mxu1 %v690_v53  ;;  %v866_v61 = vpop.permute.xlu0 %865 }
 0x475   :  { %1541 = vmatprep.subr.mxu1 %v779_v60  ;;  %1548 = vmatprep.subr.mxu0 %v866_v61  ;;  %v655_v62 = vsel %vm600_vm2, %v1643_v59, 0.0 }
 0x476   :  { %656 = vadd.xlane.f32.xlu0 %v655_v62  ;;  %1549 = vmatpush3.msra.mxu0 %v866_v61  ;;  %v777_v9 = vpop.permute.xlu1 %776  ;;  %v1418_v61 = vld [vmem:[#allocation7 + $0xe5] ss:$0 sm:$0xff] }
 0x47a   :  { %v953_v11 = vpop.permute.xlu1 %952 }
 0x47c   :  { %v1645_v63 = vpop.eup %1644 }
 0x47d   :  { %v1922_v2 = vpop.eup %1646  ;;  %v670_v3 = vsel %vm600_vm2, %v1645_v63, 0.0 }
 0x47e   :  { %v1649_v4 = vpop.eup %1648  ;;  %671 = vadd.xlane.f32.xlu1 %v670_v3  ;;  %v664_v7 = vsel %vm600_vm2, %v1922_v2, 0.0 }
 0x47f   :  { %v667_v5 = vsel %vm600_vm2, %v1649_v4, 0.0  ;;  %v1651_v6 = vpop.eup %1650 }
 0x480   :  { %668 = vadd.xlane.f32.xlu0 %v667_v5  ;;  %v661_v8 = vsel %vm600_vm2, %v1651_v6, 0.0 }
 0x482   :  { %665 = vadd.xlane.f32.xlu1 %v664_v7 }
 0x484   :  { %662 = vadd.xlane.f32.xlu0 %v661_v8 }
 0x493   :  { %950 = vrot.lane.b32.xlu1 %v1858_v45, %s1771_s30 }
 0x49a   :  { %863 = vrot.lane.b32.xlu0 %v1847_v41, %s1771_s30 }
 0x4a5   :  { %v651_v10 = vpop.xlane.xlu0 %650 }
 0x4a6   :  { %1652 = vrcp.f32 %v651_v10 }
 0x4ab   :  { %v654_v12 = vpop.xlane.xlu1 %653 }
 0x4ac   :  { %1654 = vrcp.f32 %v654_v12 }
 0x4b3   :  { %v1653_v13 = vpop.eup %1652 }
 0x4b4   :  { %v681_v14 = vmul.f32 %v1653_v13, %v1909_v31 }
 0x4b6   :  { %1538 = vmatprep.mubr.msk.f32.mxu1 %vm600_vm2, %v681_v14 }
 0x4b9   :  { %v1655_v15 = vpop.eup %1654 }
 0x4ba   :  { %v682_v16 = vmul.f32 %v1655_v15, %v1913_v33 }
 0x4bc   :  { %1539 = vmatmul.mubr.msk.f32.vlgmr.msra.gmra.mxu1 %vm600_vm2, %v682_v16  ;;  %v71_v16 = vld [vmem:[#allocation7 + $0x58] sm:$0xff] }
 0x4bd   :  { %1542 = vmatpush3.msra.mxu1 %v779_v60 }
 0x4be   :  { %1543 = vmatprep.subr.mxu1 %v777_v9 }
 0x4bf   :  { %1544 = vmatpush3.msra.mxu1 %v777_v9 }
 0x4c0   :  { %1555 = vmatprep.subr.mxu1 %v953_v11 }
 0x4fb   :  { %v660_v41 = vpop.xlane.xlu1 %659 }
 0x4fc   :  { %1656 = vrcp.f32 %v660_v41  ;;  %v70_v41 = vld [vmem:[#allocation7 + $0x50] sm:$0xff] }
 0x4ff   :  { %v657_v45 = vpop.xlane.xlu0 %656 }
 0x500   :  { %1658 = vrcp.f32 %v657_v45  ;;  %v69_v45 = vld [vmem:[#allocation7 + $0x48] sm:$0xff] }
 0x507   :  { %v672_v17 = vpop.xlane.xlu1 %671 }
 0x508   :  { %1660 = vrcp.f32 %v672_v17  ;;  %v68_v17 = vld [vmem:[#allocation7 + $0x40] sm:$0xff] }
 0x509   :  { %v669_v18 = vpop.xlane.xlu0 %668  ;;  %v1657_v20 = vpop.eup %1656 }
 0x50a   :  { %1662 = vrcp.f32 %v669_v18  ;;  %v684_v24 = vmul.f32 %v1657_v20, %v1917_v56  ;;  %v87_v18 = vld [vmem:[#allocation7 + $0xd8] sm:$0xff]  ;;  %v85_v20 = vld [vmem:[#allocation7 + $0xc8] sm:$0xff] }
 0x50b   :  { %v666_v19 = vpop.xlane.xlu1 %665 }
 0x50c   :  { %1664 = vrcp.f32 %v666_v19  ;;  %v86_v19 = vld [vmem:[#allocation7 + $0xd0] sm:$0xff] }
 0x50d   :  { %v1659_v21 = vpop.eup %1658  ;;  %v663_v22 = vpop.xlane.xlu0 %662 }
 0x50e   :  { %1666 = vrcp.f32 %v663_v22  ;;  %v683_v23 = vmul.f32 %v1659_v21, %v1643_v59 }
 0x50f   :  { %v951_v26 = vpop.permute.xlu1 %950 }
 0x510   :  { %1545 = vmatprep.mubr.msk.f32.mxu1 %vm600_vm2, %v683_v23 }
 0x511   :  { %1546 = vmatmul.mubr.msk.f32.vlgmr.msra.gmra.mxu1 %vm600_vm2, %v684_v24  ;;  %v864_v25 = vpop.permute.xlu0 %863 }
 0x512   :  { %1556 = vmatpush3.msra.mxu1 %v953_v11  ;;  %1550 = vmatprep.subr.mxu0 %v864_v25 }
 0x513   :  { %1557 = vmatprep.subr.mxu1 %v951_v26  ;;  %1551 = vmatpush3.msra.mxu0 %v864_v25 }
 0x514   :  { %1558 = vmatpush3.msra.mxu1 %v951_v26  ;;  %1562 = vmatprep.subr.mxu0 %v67_v39 }
 0x515   :  { %v1661_v27 = vpop.eup %1660  ;;  %1573 = vmatprep.subr.mxu1 %v71_v16 }
 0x516   :  { %v688_v30 = vmul.f32 %v1661_v27, %v1645_v63 }
 0x517   :  { %v1663_v28 = vpop.eup %1662 }
 0x518   :  { %v687_v29 = vmul.f32 %v1663_v28, %v1649_v4  ;;  %v1421_v28 = vld [vmem:[#allocation7 + $0xe3] ss:$0 sm:$0xff] }
 0x519   :  { %v1665_v31 = vpop.eup %1664 }
 0x51a   :  { %1559 = vmatprep.mubr.msk.f32.mxu1 %vm600_vm2, %v687_v29  ;;  %v686_v34 = vmul.f32 %v1665_v31, %v1922_v2 }
 0x51b   :  { %v1667_v32 = vpop.eup %1666  ;;  %1560 = vmatmul.mubr.msk.f32.vlgmr.msra.gmra.mxu1 %vm600_vm2, %v688_v30  ;;  %v1422_v30 = vld [vmem:[#allocation7 + $0xe4] ss:$0 sm:$0xff] }
 0x51c   :  { %v685_v33 = vmul.f32 %v1667_v32, %v1651_v6  ;;  %1574 = vmatpush3.msra.mxu1 %v71_v16 }
 0x51d   :  { %1575 = vmatprep.subr.mxu1 %v70_v41 }
 0x51e   :  { %1552 = vmatprep.mubr.msk.f32.mxu0 %vm600_vm2, %v685_v33  ;;  %1576 = vmatpush3.msra.mxu1 %v70_v41 }
 0x51f   :  { %1553 = vmatmul.mubr.msk.f32.vlgmr.msra.gmra.mxu0 %vm600_vm2, %v686_v34  ;;  %1577 = vmatprep.subr.mxu1 %v69_v45 }
 0x520   :  { %1563 = vmatpush3.msra.mxu0 %v67_v39  ;;  %1578 = vmatpush3.msra.mxu1 %v69_v45  ;;  %v82_v39 = vld [vmem:[#allocation7 + $0xb0] sm:$0xff] }
 0x521   :  { %1564 = vmatprep.subr.mxu0 %v66_v40  ;;  %1579 = vmatprep.subr.mxu1 %v68_v17 }
 0x522   :  { %1565 = vmatpush3.msra.mxu0 %v66_v40  ;;  %1580 = vmatpush3.msra.mxu1 %v68_v17  ;;  %v81_v40 = vld [vmem:[#allocation7 + $0xa8] sm:$0xff] }
 0x523   :  { %1566 = vmatprep.subr.mxu0 %v65_v42 }
 0x524   :  { %1567 = vmatpush3.msra.mxu0 %v65_v42  ;;  %v80_v42 = vld [vmem:[#allocation7 + $0xa0] sm:$0xff] }
 0x525   :  { %1568 = vmatprep.subr.mxu0 %v64_v43 }
 0x526   :  { %1569 = vmatpush3.msra.mxu0 %v64_v43  ;;  %v79_v43 = vld [vmem:[#allocation7 + $0x98] sm:$0xff] }
 0x527   :  { %1584 = vmatprep.subr.mxu0 %v87_v18 }
 0x57c   :  { %v1540_v35 = vpop.f32.mrf.mxu1 }
 0x57e   :  { %v767_v36 = vpop.f32.mrf.mxu1 }
 0x5d1   :  { %v1547_v37 = vpop.f32.mrf.mxu1 }
 0x5d2   :  { %1041 = vrot.lane.b32.xlu1 %v1547_v37, %s1765_s18  ;;  %v84_v37 = vld [vmem:[#allocation7 + $0xc0] sm:$0xff] }
 0x5d3   :  { %v854_v38 = vpop.f32.mrf.mxu1 }
 0x5d4   :  { %1039 = vrot.lane.b32.xlu0 %v854_v38, %s1765_s18  ;;  %v83_v38 = vld [vmem:[#allocation7 + $0xb8] sm:$0xff] }
 0x5db   :  { %v1561_v46 = vpop.f32.mrf.mxu1 }
 0x5dd   :  { %v1028_v48 = vpop.f32.mrf.mxu1 }
 0x5df   :  { %v1554_v44 = vpop.f32.mrf.mxu0 }
 0x5e0   :  { %1049 = vrot.lane.b32.xlu1 %v1554_v44, %s1772_s4  ;;  %v78_v44 = vld [vmem:[#allocation7 + $0x90] sm:$0xff] }
 0x5e1   :  { %v941_v47 = vpop.f32.mrf.mxu0 }
 0x5e2   :  { %1047 = vrot.lane.b32.xlu0 %v941_v47, %s1772_s4  ;;  %v76_v47 = vld [vmem:[#allocation7 + $0x80] sm:$0xff] }
 0x5e4   :  { %1057 = vrot.lane.b32.xlu1 %v1561_v46, %s1773_s5  ;;  %v77_v46 = vld [vmem:[#allocation7 + $0x88] sm:$0xff] }
 0x5e6   :  { %1055 = vrot.lane.b32.xlu0 %v1028_v48, %s1773_s5  ;;  %v75_v48 = vld [vmem:[#allocation7 + $0x78] sm:$0xff] }
 0x644   :  { %v1042_v49 = vpop.permute.xlu1 %1041 }
 0x645   :  { %v1062_v55 = vsel %vm239_vm1, %v1540_v35, %v1042_v49  ;;  %v74_v49 = vld [vmem:[#allocation7 + $0x70] sm:$0xff] }
 0x646   :  { %v1040_v50 = vpop.permute.xlu0 %1039 }
 0x647   :  { %v1061_v53 = vsel %vm239_vm1, %v767_v36, %v1040_v50  ;;  %v73_v50 = vld [vmem:[#allocation7 + $0x68] sm:$0xff] }
 0x652   :  { %v1050_v51 = vpop.permute.xlu1 %1049 }
 0x653   :  { %v1064_v58 = vsel %vm600_vm2, %v1062_v55, %v1050_v51  ;;  %v72_v51 = vld [vmem:[#allocation7 + $0x60] sm:$0xff] }
 0x654   :  { %v1048_v52 = vpop.permute.xlu0 %1047 }
 0x655   :  { %v1063_v56 = vsel %vm600_vm2, %v1061_v53, %v1048_v52  ;;  %v1423_v52 = vld [vmem:[#allocation7 + $0xe7] ss:$0 sm:$0xff] }
 0x656   :  { %v1058_v54 = vpop.permute.xlu1 %1057 }
 0x657   :  { %v1067_v60 = vsel %vm1065_vm3, %v1064_v58, %v1058_v54 }
 0x658   :  { %v1056_v57 = vpop.permute.xlu0 %1055 }
 0x659   :  { %v1066_v59 = vsel %vm1065_vm3, %v1063_v56, %v1056_v57 }
 0x65a   :  { %1570 = vmatprep.mubr.msk.f32.mxu0 %vm96_vm0, %v1066_v59 }
 0x65b   :  { %1571 = vmatmul.mubr.msk.f32.vlgmr.msra.gmra.mxu0 %vm96_vm0, %v1067_v60 }
 0x65c   :  { %1585 = vmatpush3.msra.mxu0 %v87_v18 }
 0x65d   :  { %1586 = vmatprep.subr.mxu0 %v86_v19 }
 0x65e   :  { %1587 = vmatpush3.msra.mxu0 %v86_v19 }
 0x65f   :  { %1588 = vmatprep.subr.mxu0 %v85_v20 }
 0x660   :  { %1589 = vmatpush3.msra.mxu0 %v85_v20 }
 0x661   :  { %1590 = vmatprep.subr.mxu0 %v84_v37 }
 0x662   :  { %1591 = vmatpush3.msra.mxu0 %v84_v37 }
 0x663   :  { %1592 = vmatprep.subr.mxu0 %v83_v38 }
 0x664   :  { %1593 = vmatpush3.msra.mxu0 %v83_v38 }
 0x665   :  { %1594 = vmatprep.subr.mxu0 %v82_v39 }
 0x666   :  { %1595 = vmatpush3.msra.mxu0 %v82_v39 }
 0x667   :  { %1596 = vmatprep.subr.mxu0 %v81_v40 }
 0x668   :  { %1597 = vmatpush3.msra.mxu0 %v81_v40 }
 0x669   :  { %1598 = vmatprep.subr.mxu0 %v80_v42 }
 0x66a   :  { %1599 = vmatpush3.msra.mxu0 %v80_v42 }
 0x66b   :  { %1600 = vmatprep.subr.mxu0 %v79_v43 }
 0x66c   :  { %1601 = vmatpush3.msra.mxu0 %v79_v43 }
 0x66d   :  { %1602 = vmatprep.subr.mxu0 %v78_v44 }
 0x66e   :  { %1603 = vmatpush3.msra.mxu0 %v78_v44 }
 0x66f   :  { %1604 = vmatprep.subr.mxu0 %v77_v46 }
 0x670   :  { %1605 = vmatpush3.msra.mxu0 %v77_v46 }
 0x671   :  { %1606 = vmatprep.subr.mxu0 %v76_v47 }
 0x672   :  { %1607 = vmatpush3.msra.mxu0 %v76_v47 }
 0x673   :  { %1608 = vmatprep.subr.mxu0 %v75_v48 }
 0x674   :  { %1609 = vmatpush3.msra.mxu0 %v75_v48 }
 0x675   :  { %1610 = vmatprep.subr.mxu0 %v74_v49 }
 0x676   :  { %1611 = vmatpush3.msra.mxu0 %v74_v49 }
 0x677   :  { %1612 = vmatprep.subr.mxu0 %v73_v50 }
 0x678   :  { %1613 = vmatpush3.msra.mxu0 %v73_v50 }
 0x679   :  { %1614 = vmatprep.subr.mxu0 %v72_v51 }
 0x67a   :  { %1615 = vmatpush3.msra.mxu0 %v72_v51 }
 0x71b   :  { %v1572_v62 = vpop.f32.mrf.mxu0 }
 0x71c   :  { %v1150_v63 = vadd.f32 %v1572_v62, %v1418_v61 }
 0x71d   :  { %v1144_v2 = vpop.f32.mrf.mxu0 }
 0x71e   :  { %v1954_v3 = vadd.f32 %v1150_v63, %v1815_v1  ;;  %v1145_v4 = vadd.f32 %v1418_v61, %v1144_v2 }
 0x720   :  { %v1957_v5 = vadd.f32 %v1145_v4, %v1813_v0  ;;  %v1158_v6 = vsel %vm96_vm0, %v1954_v3, 0.0 }
 0x721   :  { %1159 = vadd.xlane.f32.xlu1 %v1158_v6 }
 0x722   :  { %v1155_v7 = vsel %vm96_vm0, %v1957_v5, 0.0 }
 0x723   :  { %1156 = vadd.xlane.f32.xlu0 %v1155_v7  ;;  %v1426_v7 = vld [vmem:[#allocation7 + $0xe6] ss:$0 sm:$0xff] }
 0x7aa   :  { %v1160_v8 = vpop.xlane.xlu1 %1159 }
 0x7ab   :  { %v1162_v9 = vmul.f32 0.03125, %v1160_v8 }
 0x7ac   :  { %v1157_v10 = vpop.xlane.xlu0 %1156 }
 0x7ad   :  { %v1161_v11 = vmul.f32 0.03125, %v1157_v10  ;;  %v1164_v12 = vsub.f32 %v1954_v3, %v1162_v9 }
 0x7af   :  { %v1163_v1 = vsub.f32 %v1957_v5, %v1161_v11  ;;  %v1166_v14 = vmul.f32 %v1164_v12, %v1164_v12 }
 0x7b1   :  { %v1165_v13 = vmul.f32 %v1163_v1, %v1163_v1  ;;  %v1170_v15 = vsel %vm96_vm0, %v1166_v14, 0.0 }
 0x7b3   :  { %v1167_v0 = vsel %vm96_vm0, %v1165_v13, 0.0 }
 0x7b4   :  { %1168 = vadd.xlane.f32.xlu0 %v1167_v0 }
 0x7b8   :  { %1171 = vadd.xlane.f32.xlu0 %v1170_v15 }
 0x83d   :  { %v1169_v21 = vpop.xlane.xlu0 %1168 }
 0x83e   :  { %v1173_v22 = vmul.f32 0.03125, %v1169_v21 }
 0x840   :  { %v1175_v23 = vadd.f32 1e-05, %v1173_v22 }
 0x841   :  { %v1172_v24 = vpop.xlane.xlu0 %1171 }
 0x842   :  { %1668 = vrsqrt.f32 %v1175_v23  ;;  %v1174_v25 = vmul.f32 0.03125, %v1172_v24 }
 0x844   :  { %v1176_v26 = vadd.f32 1e-05, %v1174_v25 }
 0x846   :  { %1670 = vrsqrt.f32 %v1176_v26 }
 0x84f   :  { %v1669_v27 = vpop.eup %1668 }
 0x850   :  { %v1179_v29 = vmul.f32 %v1669_v27, %v1163_v1 }
 0x852   :  { %v1185_v31 = vmul.f32 %v1421_v28, %v1179_v29 }
 0x853   :  { %v1671_v32 = vpop.eup %1670 }
 0x854   :  { %v1180_v33 = vmul.f32 %v1671_v32, %v1164_v12  ;;  %v1191_v34 = vadd.f32 %v1422_v30, %v1185_v31 }
 0x856   :  { %v1186_v35 = vmul.f32 %v1421_v28, %v1180_v33  ;;  %1581 = vmatprep.mubr.msk.f32.mxu1 %vm96_vm0, %v1191_v34 }
 0x858   :  { %v1192_v36 = vadd.f32 %v1422_v30, %v1186_v35 }
 0x85a   :  { %1582 = vmatmul.mubr.msk.f32.vlgmr.msra.gmra.mxu1 %vm96_vm0, %v1192_v36 }
 0x91a   :  { %v1583_v53 = vpop.f32.mrf.mxu1 }
 0x91b   :  { %v1275_v54 = vadd.f32 %v1583_v53, %v1423_v52 }
 0x91c   :  { %v1269_v55 = vpop.f32.mrf.mxu1 }
 0x91d   :  { %v1281_v56 = vmul.f32 0.70710677, %v1275_v54  ;;  %v1270_v57 = vadd.f32 %v1423_v52, %v1269_v55  ;;  %v1279_v2 = vmul.f32 0.5, %v1275_v54 }
 0x91f   :  { %1672 = verf.f32 %v1281_v56  ;;  %v1280_v58 = vmul.f32 0.70710677, %v1270_v57  ;;  %v1278_v62 = vmul.f32 0.5, %v1270_v57 }
 0x921   :  { %1674 = verf.f32 %v1280_v58 }
 0x92c   :  { %v1673_v59 = vpop.eup %1672 }
 0x92d   :  { %v1285_v61 = vadd.f32 1.0, %v1673_v59 }
 0x92e   :  { %v1675_v60 = vpop.eup %1674 }
 0x92f   :  { %v1284_v63 = vadd.f32 1.0, %v1675_v60  ;;  %v1287_v6 = vmul.f32 %v1285_v61, %v1279_v2 }
 0x931   :  { %v1286_v4 = vmul.f32 %v1284_v63, %v1278_v62 }
 0x933   :  { %1616 = vmatprep.mubr.f32.mxu0 %v1286_v4 }
 0x934   :  { %1617 = vmatmul.mubr.f32.vlgmr.msra.gmra.mxu0 %v1287_v6 }
 0x9f4   :  { %v1618_v8 = vpop.f32.mrf.mxu0 }
 0x9f5   :  { %v1364_v9 = vadd.f32 %v1618_v8, %v1426_v7 }
 0x9f6   :  { %v1358_v10 = vpop.f32.mrf.mxu0 }
 0x9f7   :  { %v1368_v11 = vadd.f32 %v1364_v9, %v1954_v3  ;;  %v1359_v12 = vadd.f32 %v1426_v7, %v1358_v10 }
 0x9f9   :  { %1370 = vst.msk [vmem:[#allocation8 + $0x8] sm:$0xff] %vm96_vm0, %v1368_v11  ;;  %v1367_v1 = vadd.f32 %v1359_v12, %v1957_v5 }
 0x9fb   :  { %1369 = vst.msk [vmem:[#allocation8] sm:$0xff] %vm96_vm0, %v1367_v1 }
 0x9fc   :  { %1747 = shalt.err (!%p1744_p5)
}
 0x9fd   :  { %1382 = dma.vmem_to_hbm [thread:$0]  %s1377_s7, 256, %s1982_s3, [#allocation4], %s1764_s17, %s1764_s17, %s1765_s18  }
 0x9fe   :  { %1760 = dma.done.wait [#allocation4], 256  }
 0x9ff   :  { %1761 = vsyncadd [#allocation4], 4294967040 }
 0xa00   :  { %1386 = vsyncpa [#allocation3], 1 }
 0xa01   :  { %1387 = vsyncpa [#allocation6], 1 }
 0xa02   :  { %1388 = vsyncpa [#allocation4], 1 }

</bundles_post_ra>
